<compile_context>
chip_gen: v6e
topology: v6e:2x2x1
jax: 0.10.0
libtpu: 0.0.40
codegen_flags: <defaults>
</compile_context>

<pallas_src>
import jax
import jax.numpy as jnp
from jax.experimental import pallas as pl
from jax.experimental.pallas import tpu as pltpu


def _spatial_dropout_kernel(mask_ref, x_ref, o_ref):
    # mask_ref: (TILE_R, 1) float32 pre-scaled keep-mask {0, 1/(1-p)}
    # x_ref / o_ref: (TILE_R, TILE_L) in x.dtype
    o_ref[...] = (x_ref[...] * mask_ref[...]).astype(o_ref.dtype)


def _cdiv(a, b):
    return -(-a // b)


def _select_tiles(rows, L, dtype):
    """Byte-budgeted, dtype-aware (tile_r, tile_l) selection."""
    itemsize = jnp.dtype(dtype).itemsize
    sub = max(8, 32 // max(itemsize, 1))      # sublane pack: f32->8, bf16->16, int8->32
    lane_pad = _cdiv(L, 128) * 128            # VMEM footprint of a full-L row
    budget = 4 * 1024 * 1024                  # bytes per x block (~16 MiB double-buffered)

    if lane_pad * sub * itemsize <= budget:
        # Full-L lane block: no ragged lane tiles, contiguous per-row DMA.
        tile_l = L
        tile_r = (budget // (lane_pad * itemsize)) // sub * sub   # >= sub by branch cond.
        if tile_r >= rows:
            tile_r = rows
            # Keep >= 2 grid steps on the parallel row axis so both v7x TCs
            # get work and input/output DMAs can actually pipeline.
            if rows > sub:
                half = _cdiv(_cdiv(rows, 2), sub) * sub
                if half < rows:
                    tile_r = half
    else:
        # L too large for a full-L block even at `sub` rows (rare): lane-tile
        # with a 128-aligned width filling the budget.
        tile_r = sub
        tile_l = min(lane_pad, (budget // (sub * itemsize)) // 128 * 128)
    return tile_r, tile_l


def spatial_dropout1d(x, key, drop_rate, training=True, donate_x=False):
    """SpatialDropout1d forward. x: (N, C, L). training/drop_rate are static."""
    if (not training) or drop_rate == 0.0:
        return x  # eval mode / p=0 -> identity, exactly like nn.Dropout2d
    if drop_rate >= 1.0:
        return jnp.zeros_like(x)  # Dropout2d(p=1.0) zeroes everything

    N, C, L = x.shape
    rows = N * C
    keep_prob = 1.0 - drop_rate

    # One Bernoulli draw per (sample, channel); fold 1/(1-p) into the mask.
    # Mask stays float32 (closer to PyTorch's float scale; tiny array, free).
    keep = jax.random.bernoulli(key, p=keep_prob, shape=(rows, 1))
    scaled_mask = keep.astype(jnp.float32) * jnp.float32(1.0 / keep_prob)

    x2 = x.reshape(rows, L)

    tile_r, tile_l = _select_tiles(rows, L, x.dtype)
    grid = (_cdiv(rows, tile_r), _cdiv(L, tile_l))

    extra = {}
    if donate_x:
        # Reuse x2's HBM buffer for the output (only if caller no longer needs x).
        extra["input_output_aliases"] = {1: 0}

    out2 = pl.pallas_call(
        _spatial_dropout_kernel,
        out_shape=jax.ShapeDtypeStruct((rows, L), x.dtype),
        grid=grid,
        in_specs=[
            # Mask block index is constant across the inner (lane) grid axis,
            # so it stays resident instead of re-DMA'ing every step.
            pl.BlockSpec((tile_r, 1), lambda r, l: (r, 0)),
            pl.BlockSpec((tile_r, tile_l), lambda r, l: (r, l)),
        ],
        out_specs=pl.BlockSpec((tile_r, tile_l), lambda r, l: (r, l)),
        compiler_params=pltpu.CompilerParams(
            dimension_semantics=("parallel", "parallel"),
            vmem_limit_bytes=32 * 1024 * 1024,
        ),
        **extra,
    )(scaled_mask, x2)

    return out2.reshape(N, C, L)


if __name__ == "__main__":
    key = jax.random.PRNGKey(0)
    kx, kd = jax.random.split(key)

    # --- Small shape (full-dim blocks, (1,1) grid) ---
    N, C, L = 2, 4, 16
    drop_rate = 0.5
    x = jax.random.normal(kx, (N, C, L), dtype=jnp.float32)

    y = spatial_dropout1d(x, kd, drop_rate, training=True)
    jax.block_until_ready(y)

    y_np = jax.device_get(y)
    x_np = jax.device_get(x)
    scale = 1.0 / (1.0 - drop_rate)
    for n in range(N):
        for c in range(C):
            row = y_np[n, c]
            ok_zero = bool(jnp.allclose(row, 0.0))
            ok_keep = bool(jnp.allclose(row, x_np[n, c] * scale, rtol=1e-6, atol=1e-6))
            assert ok_zero or ok_keep, f"channel ({n},{c}) neither dropped nor scaled"

    # Eval mode must be identity.
    y_eval = spatial_dropout1d(x, kd, drop_rate, training=False)
    assert bool(jnp.allclose(jax.device_get(y_eval), x_np))

    # p = 1.0 must be all zeros (PyTorch Dropout2d(p=1.0) semantics).
    y_all_drop = spatial_dropout1d(x, kd, 1.0, training=True)
    assert bool(jnp.allclose(jax.device_get(y_all_drop), 0.0))

    # --- Larger f32 shape: full-L lane block, 2-step parallel row grid ---
    N2, C2, L2 = 4, 96, 1200   # rows=384 -> split into 2 row tiles of 192
    x_big = jax.random.normal(kx, (N2, C2, L2), dtype=jnp.float32)
    y_big = spatial_dropout1d(x_big, kd, 0.3, training=True)
    jax.block_until_ready(y_big)
    yb = jax.device_get(y_big)
    xb = jax.device_get(x_big)
    sb = 1.0 / (1.0 - 0.3)
    for n, c in [(0, 0), (1, 17), (2, 63), (3, 95)]:
        row = yb[n, c]
        ok_zero = bool(jnp.allclose(row, 0.0))
        ok_keep = bool(jnp.allclose(row, xb[n, c] * sb, rtol=1e-5, atol=1e-5))
        assert ok_zero or ok_keep, f"big channel ({n},{c}) neither dropped nor scaled"

    # --- bf16 path: dtype-aware row tile (multiple of 16), f32 mask ---
    N3, C3, L3 = 2, 64, 300    # rows=128 -> split into 2 row tiles of 64
    x_bf = jax.random.normal(kx, (N3, C3, L3), dtype=jnp.bfloat16)
    y_bf = spatial_dropout1d(x_bf, kd, 0.25, training=True)
    jax.block_until_ready(y_bf)
    ybf = jax.device_get(y_bf).astype(jnp.float32)
    xbf = jax.device_get(x_bf).astype(jnp.float32)
    sbf = 1.0 / (1.0 - 0.25)
    for n, c in [(0, 0), (0, 31), (1, 63)]:
        row = ybf[n, c]
        ok_zero = bool(jnp.allclose(row, 0.0))
        ok_keep = bool(jnp.allclose(row, xbf[n, c] * sbf, rtol=2e-2, atol=2e-2))
        assert ok_zero or ok_keep, f"bf16 channel ({n},{c}) neither dropped nor scaled"

    print("KERNEL_OK")
</pallas_src>

<mosaic_0001>
module attributes {stable_mosaic.version = 11 : i64} {
  func.func @_spatial_dropout_kernel(%arg0: i32, %arg1: i32, %arg2: memref<8x1xf32, #tpu.memory_space<vmem>>, %arg3: memref<8x16xf32, #tpu.memory_space<vmem>>, %arg4: memref<8x16xf32, #tpu.memory_space<vmem>>) attributes {dimension_semantics = [#tpu.dimension_semantics<parallel>, #tpu.dimension_semantics<parallel>], iteration_bounds = array<i64: 1, 1>, scalar_prefetch = 0 : i64, scratch_operands = 0 : i64, tpu.core_type = #tpu.core_type<tc>, window_params = [{transform_indices = @transform_0, window_bounds = array<i64: 8, 1>}, {transform_indices = @transform_1, window_bounds = array<i64: 8, 16>}, {transform_indices = @transform_2, window_bounds = array<i64: 8, 16>}]} {
    %c0 = arith.constant 0 : index
    %c0_0 = arith.constant 0 : index
    %0 = vector.load %arg3[%c0, %c0_0] : memref<8x16xf32, #tpu.memory_space<vmem>>, vector<8x16xf32>
    %c0_1 = arith.constant 0 : index
    %c0_2 = arith.constant 0 : index
    %1 = vector.load %arg2[%c0_1, %c0_2] : memref<8x1xf32, #tpu.memory_space<vmem>>, vector<8x1xf32>
    %2 = vector.broadcast %1 : vector<8x1xf32> to vector<8x16xf32>
    %3 = arith.mulf %0, %2 : vector<8x16xf32>
    %c0_3 = arith.constant 0 : index
    %c0_4 = arith.constant 0 : index
    %4 = vector.load %arg4[%c0_3, %c0_4] : memref<8x16xf32, #tpu.memory_space<vmem>>, vector<8x16xf32>
    tpu.vector_store %arg4[%c0_3, %c0_4], %3 {strides = array<i32>} : memref<8x16xf32, #tpu.memory_space<vmem>>, vector<8x16xf32>,
    return
  }
  func.func @transform_0(%arg0: i32, %arg1: i32) -> (i32, i32) {
    %c0_i32 = arith.constant 0 : i32
    %c0_i32_0 = arith.constant 0 : i32
    return %arg0, %c0_i32 : i32, i32
  }
  func.func @transform_1(%arg0: i32, %arg1: i32) -> (i32, i32) {
    %c0_i32 = arith.constant 0 : i32
    return %arg0, %arg1 : i32, i32
  }
  func.func @transform_2(%arg0: i32, %arg1: i32) -> (i32, i32) {
    %c0_i32 = arith.constant 0 : i32
    return %arg0, %arg1 : i32, i32
  }
}

</mosaic_0001>

<bundles_post_ra>
// kernel: tpu_custom_call.1
= control target key start
LH: loop header
LB: loop body
LE: loop exit
PB: predicated region body
PF: predicated region fallthrough
CT: control target
= control target key end

     0   :  { %s87_s0 = inlined_call_operand.vmem [shape: f32[8,1], index: 0, kind: input, shape index: {}]   ;;  %s88_s1 = inlined_call_operand.vmem [shape: f32[8,16], index: 1, kind: input, shape index: {}]   ;;  %s89_s2 = inlined_call_operand.hbm [shape: f32[8,16], index: 2, kind: output, shape index: {}]  }
   0x1   :  { %v13_v0 = vld [vmem:[%s87_s0] sm:$0xff] }
   0x2   :  { %7 = vsyncpa [#allocation3], 0  ;;  %v61_v1 = vmov 0   ;;  %v12_v2 = vld [vmem:[%s88_s1] sm:$0xff]  ;;  %s62_s13 = smov [#allocation2]   ;;  %vm20_vm0 = vcmask 130048  }
   0x3   :  { %38 = vset.pattern.permute.xlu0 %v61_v1  ;;  %s28_s14 = sshll.u32 %s62_s13, 4  ;;  %s29_s14 = int_to_ptr.vmem [resolvable:$true] %s28_s14 }
   0x4   :  { %16 = vperm.xlu0 %38, %v13_v0   ;;  %s39_s15 = scalar_lea.vmem %s29_s14, 128  ;;  %p44_p1 = scmp.lt.s32.totalorder %s29_s14, %s29_s14 }
   0x5   :  { %p40_p0 = scmp.ne.s32.totalorder %s29_s14, %s39_s15  ;;  %p45_p2 = scmp.lt.s32.totalorder %s39_s15, %s39_s15 }
   0x7   :  { %p46_p3 = por %p45_p2, %p44_p1 }
   0x9   :  { %p47_p4 = pnand %p46_p3, %p40_p0 }
  0x7f   :  { %v17_v3 = vpop.permute.xlu0 %16 }
  0x80   :  { %v19_v4 = vmul.f32 %v17_v3, %v12_v2 }
  0x82   :  { %21 = vst.msk [vmem:[#allocation2] sm:$0xff] %vm20_vm0, %v19_v4 }
  0x83   :  { %50 = shalt.err (!%p47_p4)
}
  0x84   :  { %31 = dma.vmem_to_hbm [thread:$0]  %s29_s14, 128, %s89_s2, [#allocation3]  }
  0x85   :  { %59 = dma.done.wait [#allocation3], 128  }
  0x86   :  { %60 = vsyncadd [#allocation3], 4294967168 }
  0x87   :  { %35 = vsyncpa [#allocation3], 1 }

</bundles_post_ra>
